<compile_context>
chip_gen: v7x
topology: tpu7x:2x2x1
jax: 0.10.0
libtpu: 0.0.40
codegen_flags: <defaults>
</compile_context>

<pallas_src>
import jax
import jax.numpy as jnp
from jax.experimental import pallas as pl
from jax.experimental.pallas import tpu as pltpu


def _dhn_kernel(x_ref, w1_ref, w2_ref, o_ref):
    # x_ref / o_ref : (C, HW) slab for one batch element (batch dim squeezed)
    # w1_ref        : (num_blocks, Cr, C)   -- fc1 conv weights (out, in)
    # w2_ref        : (num_blocks, C, Cr)   -- fc2 conv weights (out, in)
    num_blocks = w1_ref.shape[0]
    for blk in range(num_blocks):          # static unroll; blocks are serial anyway
        src = x_ref if blk == 0 else o_ref

        # Global avg / max pooling over spatial (lane) dim, accumulate in f32.
        xf = src[...].astype(jnp.float32)                      # (C, HW)
        avg = jnp.mean(xf, axis=-1, keepdims=True)             # (C, 1)
        mx = jnp.max(xf, axis=-1, keepdims=True)               # (C, 1)

        w1 = w1_ref[blk]                                       # (Cr, C)
        w2 = w2_ref[blk]                                       # (C, Cr)

        # relu(W1@avg) + relu(W1@max), then W2 @ (.)  (linearity fold of fc2).
        h = (jnp.maximum(jnp.dot(w1, avg, preferred_element_type=jnp.float32), 0.0)
             + jnp.maximum(jnp.dot(w1, mx, preferred_element_type=jnp.float32), 0.0))
        att = jax.nn.sigmoid(
            jnp.dot(w2, h, preferred_element_type=jnp.float32))  # (C, 1)

        # Scale in the activation dtype; (C,1) broadcasts over the lane dim.
        o_ref[...] = (src[...] * att.astype(o_ref.dtype)).astype(o_ref.dtype)


def dhn_forward(x_nchw, w1s, w2s):
    """DHN forward.

    x_nchw: (N, C, H, W)  (PyTorch layout)
    w1s:    (num_blocks, C // r, C)   fc1 weights (Conv2d 1x1, bias=False)
    w2s:    (num_blocks, C, C // r)   fc2 weights
    """
    N, C, H, W = x_nchw.shape
    HW = H * W
    num_blocks, Cr, _ = w1s.shape

    x = x_nchw.reshape(N, C, HW)  # free reshape, no transpose / data movement

    # TODO(synk): for very large HW*C slabs, add an HW-tile grid axis with a
    # two-pass reduce(sum/max)-then-apply scheme instead of one block per batch.
    elt = jnp.dtype(x.dtype).itemsize
    slab_bytes = C * HW * elt
    w_bytes = (w1s.size + w2s.size) * jnp.dtype(w1s.dtype).itemsize
    # double-buffered input + output slabs + weights + slack, clamped for v7x.
    vmem_limit = int(min(100 << 20, max(32 << 20, 4 * slab_bytes + 2 * w_bytes + (4 << 20))))

    cost = pl.CostEstimate(
        flops=int(N * num_blocks * (4 * C * HW + 6 * C * Cr)),
        transcendentals=int(N * num_blocks * C),
        bytes_accessed=int(2 * N * C * HW * elt + w_bytes),
    )

    out = pl.pallas_call(
        _dhn_kernel,
        out_shape=jax.ShapeDtypeStruct((N, C, HW), x.dtype),
        grid_spec=pltpu.PrefetchScalarGridSpec(
            num_scalar_prefetch=0,
            grid=(N,),
            in_specs=[
                pl.BlockSpec((pl.Squeezed(), C, HW), lambda b: (b, 0, 0)),
                pl.BlockSpec((num_blocks, Cr, C), lambda b: (0, 0, 0)),
                pl.BlockSpec((num_blocks, C, Cr), lambda b: (0, 0, 0)),
            ],
            out_specs=pl.BlockSpec((pl.Squeezed(), C, HW), lambda b: (b, 0, 0)),
        ),
        compiler_params=pltpu.CompilerParams(
            dimension_semantics=("parallel",),
            vmem_limit_bytes=vmem_limit,
        ),
        cost_estimate=cost,
        input_output_aliases={0: 0},  # x is dead after the kernel
    )(x, w1s, w2s)

    return out.reshape(N, C, H, W)


def init_dhn_params(key, in_planes, num_blocks, reduction_ratio=16):
    cr = in_planes // reduction_ratio
    k1, k2 = jax.random.split(key)
    # Conv2d(in, out, 1, bias=False) weight is (out, in, 1, 1); we keep (out, in).
    w1s = jax.random.normal(k1, (num_blocks, cr, in_planes), jnp.float32) * 0.1
    w2s = jax.random.normal(k2, (num_blocks, in_planes, cr), jnp.float32) * 0.1
    return w1s, w2s


def _reference(x_nchw, w1s, w2s):
    # Pure-JAX reference of DHN for sanity checking.
    x = x_nchw
    for i in range(w1s.shape[0]):
        avg = jnp.mean(x, axis=(2, 3))                       # (N, C)
        mx = jnp.max(x, axis=(2, 3))                         # (N, C)
        h_avg = jnp.maximum(avg @ w1s[i].T, 0.0)
        h_max = jnp.maximum(mx @ w1s[i].T, 0.0)
        att = jax.nn.sigmoid(h_avg @ w2s[i].T + h_max @ w2s[i].T)
        x = x * att[:, :, None, None]
    return x


if __name__ == "__main__":
    key = jax.random.PRNGKey(0)
    kx, kp = jax.random.split(key)

    N, C, H, W = 2, 32, 16, 16          # in_planes=32 -> reduced channels = 2
    num_blocks = 2

    x = jax.random.normal(kx, (N, C, H, W), jnp.float32)
    w1s, w2s = init_dhn_params(kp, C, num_blocks)

    # Compute the reference first (robust even under input/output aliasing).
    ref = jax.block_until_ready(_reference(x, w1s, w2s))

    out = dhn_forward(x, w1s, w2s)
    out = jax.block_until_ready(out)

    assert out.shape == (N, C, H, W)
    assert jnp.max(jnp.abs(out - ref)) < 1e-4

    print("KERNEL_OK")
</pallas_src>

<mosaic_0001>
module attributes {stable_mosaic.version = 11 : i64} {
  func.func @_dhn_kernel(%arg0: i32, %arg1: memref<1x32x256xf32, #tpu.memory_space<vmem>>, %arg2: memref<2x2x32xf32, #tpu.memory_space<vmem>>, %arg3: memref<2x32x2xf32, #tpu.memory_space<vmem>>, %arg4: memref<1x32x256xf32, #tpu.memory_space<vmem>>) attributes {dimension_semantics = [#tpu.dimension_semantics<parallel>], iteration_bounds = array<i64: 2>, scalar_prefetch = 0 : i64, scratch_operands = 0 : i64, tpu.core_type = #tpu.core_type<tc>, window_params = [{transform_indices = @transform_0, window_bounds = array<i64: 1, 32, 256>}, {pipeline_mode = #tpu.pipeline_mode<synchronous>, transform_indices = @transform_1, window_bounds = array<i64: 2, 2, 32>}, {pipeline_mode = #tpu.pipeline_mode<synchronous>, transform_indices = @transform_2, window_bounds = array<i64: 2, 32, 2>}, {transform_indices = @transform_3, window_bounds = array<i64: 1, 32, 256>}]} {
    %c0 = arith.constant 0 : index
    %c0_0 = arith.constant 0 : index
    %c0_1 = arith.constant 0 : index
    %0 = vector.load %arg1[%c0, %c0_0, %c0_1] : memref<1x32x256xf32, #tpu.memory_space<vmem>>, vector<1x32x256xf32>
    %1 = vector.shape_cast %0 : vector<1x32x256xf32> to vector<32x256xf32>
    %cst = arith.constant dense<0.000000e+00> : vector<32xf32>
    %2 = vector.multi_reduction <add>, %1, %cst [1] : vector<32x256xf32> to vector<32xf32>
    %3 = vector.shape_cast %2 : vector<32xf32> to vector<32x1xf32>
    %cst_2 = arith.constant 2.560000e+02 : f32
    %4 = vector.broadcast %cst_2 : f32 to vector<32x1xf32>
    %5 = arith.divf %3, %4 : vector<32x1xf32>
    %cst_3 = arith.constant dense<0xFF800000> : vector<32xf32>
    %6 = vector.multi_reduction <maximumf>, %1, %cst_3 [1] : vector<32x256xf32> to vector<32xf32>
    %7 = vector.shape_cast %6 : vector<32xf32> to vector<32x1xf32>
    %c0_4 = arith.constant 0 : index
    %c0_5 = arith.constant 0 : index
    %c0_6 = arith.constant 0 : index
    %8 = vector.load %arg2[%c0_4, %c0_5, %c0_6] : memref<2x2x32xf32, #tpu.memory_space<vmem>>, vector<1x2x32xf32>
    %9 = vector.shape_cast %8 : vector<1x2x32xf32> to vector<2x32xf32>
    %c0_7 = arith.constant 0 : index
    %c0_8 = arith.constant 0 : index
    %c0_9 = arith.constant 0 : index
    %10 = vector.load %arg3[%c0_7, %c0_8, %c0_9] : memref<2x32x2xf32, #tpu.memory_space<vmem>>, vector<1x32x2xf32>
    %11 = vector.shape_cast %10 : vector<1x32x2xf32> to vector<32x2xf32>
    %cst_10 = arith.constant dense<0.000000e+00> : vector<2x1xf32>
    %12 = tpu.matmul %9, %5, %cst_10 {dimension_numbers = #tpu.dot_dimension_numbers<[1], [0], [0], [1], [0, 0, 1, 1], [], []>} : vector<2x32xf32>, vector<32x1xf32>, vector<2x1xf32> -> vector<2x1xf32>
    %cst_11 = arith.constant 0.000000e+00 : f32
    %13 = vector.broadcast %cst_11 : f32 to vector<2x1xf32>
    %14 = arith.maximumf %12, %13 : vector<2x1xf32>
    %cst_12 = arith.constant dense<0.000000e+00> : vector<2x1xf32>
    %15 = tpu.matmul %9, %7, %cst_12 {dimension_numbers = #tpu.dot_dimension_numbers<[1], [0], [0], [1], [0, 0, 1, 1], [], []>} : vector<2x32xf32>, vector<32x1xf32>, vector<2x1xf32> -> vector<2x1xf32>
    %cst_13 = arith.constant 0.000000e+00 : f32
    %16 = vector.broadcast %cst_13 : f32 to vector<2x1xf32>
    %17 = arith.maximumf %15, %16 : vector<2x1xf32>
    %18 = arith.addf %14, %17 : vector<2x1xf32>
    %cst_14 = arith.constant dense<0.000000e+00> : vector<32x1xf32>
    %19 = tpu.matmul %11, %18, %cst_14 {dimension_numbers = #tpu.dot_dimension_numbers<[1], [0], [0], [1], [0, 0, 1, 1], [], []>} : vector<32x2xf32>, vector<2x1xf32>, vector<32x1xf32> -> vector<32x1xf32>
    %20 = arith.negf %19 : vector<32x1xf32>
    %21 = math.exp %20 : vector<32x1xf32>
    %cst_15 = arith.constant 1.000000e+00 : f32
    %22 = vector.broadcast %cst_15 : f32 to vector<32x1xf32>
    %23 = arith.addf %22, %21 : vector<32x1xf32>
    %24 = arith.divf %22, %23 : vector<32x1xf32>
    %c0_16 = arith.constant 0 : index
    %c0_17 = arith.constant 0 : index
    %c0_18 = arith.constant 0 : index
    %25 = vector.load %arg1[%c0_16, %c0_17, %c0_18] : memref<1x32x256xf32, #tpu.memory_space<vmem>>, vector<1x32x256xf32>
    %26 = vector.shape_cast %25 : vector<1x32x256xf32> to vector<32x256xf32>
    %27 = vector.broadcast %24 : vector<32x1xf32> to vector<32x256xf32>
    %28 = arith.mulf %26, %27 : vector<32x256xf32>
    %c0_19 = arith.constant 0 : index
    %c0_20 = arith.constant 0 : index
    %c0_21 = arith.constant 0 : index
    %29 = vector.load %arg4[%c0_19, %c0_20, %c0_21] : memref<1x32x256xf32, #tpu.memory_space<vmem>>, vector<1x32x256xf32>
    %30 = vector.shape_cast %29 : vector<1x32x256xf32> to vector<32x256xf32>
    %31 = vector.shape_cast %28 : vector<32x256xf32> to vector<1x32x256xf32>
    tpu.vector_store %arg4[%c0_19, %c0_20, %c0_21], %31 {strides = array<i32>} : memref<1x32x256xf32, #tpu.memory_space<vmem>>, vector<1x32x256xf32>,
    %c0_22 = arith.constant 0 : index
    %c0_23 = arith.constant 0 : index
    %c0_24 = arith.constant 0 : index
    %32 = vector.load %arg4[%c0_22, %c0_23, %c0_24] : memref<1x32x256xf32, #tpu.memory_space<vmem>>, vector<1x32x256xf32>
    %33 = vector.shape_cast %32 : vector<1x32x256xf32> to vector<32x256xf32>
    %cst_25 = arith.constant dense<0.000000e+00> : vector<32xf32>
    %34 = vector.multi_reduction <add>, %33, %cst_25 [1] : vector<32x256xf32> to vector<32xf32>
    %35 = vector.shape_cast %34 : vector<32xf32> to vector<32x1xf32>
    %cst_26 = arith.constant 2.560000e+02 : f32
    %36 = vector.broadcast %cst_26 : f32 to vector<32x1xf32>
    %37 = arith.divf %35, %36 : vector<32x1xf32>
    %cst_27 = arith.constant dense<0xFF800000> : vector<32xf32>
    %38 = vector.multi_reduction <maximumf>, %33, %cst_27 [1] : vector<32x256xf32> to vector<32xf32>
    %39 = vector.shape_cast %38 : vector<32xf32> to vector<32x1xf32>
    %c1 = arith.constant 1 : index
    %c0_28 = arith.constant 0 : index
    %c0_29 = arith.constant 0 : index
    %40 = vector.load %arg2[%c1, %c0_28, %c0_29] : memref<2x2x32xf32, #tpu.memory_space<vmem>>, vector<1x2x32xf32>
    %41 = vector.shape_cast %40 : vector<1x2x32xf32> to vector<2x32xf32>
    %c1_30 = arith.constant 1 : index
    %c0_31 = arith.constant 0 : index
    %c0_32 = arith.constant 0 : index
    %42 = vector.load %arg3[%c1_30, %c0_31, %c0_32] : memref<2x32x2xf32, #tpu.memory_space<vmem>>, vector<1x32x2xf32>
    %43 = vector.shape_cast %42 : vector<1x32x2xf32> to vector<32x2xf32>
    %cst_33 = arith.constant dense<0.000000e+00> : vector<2x1xf32>
    %44 = tpu.matmul %41, %37, %cst_33 {dimension_numbers = #tpu.dot_dimension_numbers<[1], [0], [0], [1], [0, 0, 1, 1], [], []>} : vector<2x32xf32>, vector<32x1xf32>, vector<2x1xf32> -> vector<2x1xf32>
    %cst_34 = arith.constant 0.000000e+00 : f32
    %45 = vector.broadcast %cst_34 : f32 to vector<2x1xf32>
    %46 = arith.maximumf %44, %45 : vector<2x1xf32>
    %cst_35 = arith.constant dense<0.000000e+00> : vector<2x1xf32>
    %47 = tpu.matmul %41, %39, %cst_35 {dimension_numbers = #tpu.dot_dimension_numbers<[1], [0], [0], [1], [0, 0, 1, 1], [], []>} : vector<2x32xf32>, vector<32x1xf32>, vector<2x1xf32> -> vector<2x1xf32>
    %cst_36 = arith.constant 0.000000e+00 : f32
    %48 = vector.broadcast %cst_36 : f32 to vector<2x1xf32>
    %49 = arith.maximumf %47, %48 : vector<2x1xf32>
    %50 = arith.addf %46, %49 : vector<2x1xf32>
    %cst_37 = arith.constant dense<0.000000e+00> : vector<32x1xf32>
    %51 = tpu.matmul %43, %50, %cst_37 {dimension_numbers = #tpu.dot_dimension_numbers<[1], [0], [0], [1], [0, 0, 1, 1], [], []>} : vector<32x2xf32>, vector<2x1xf32>, vector<32x1xf32> -> vector<32x1xf32>
    %52 = arith.negf %51 : vector<32x1xf32>
    %53 = math.exp %52 : vector<32x1xf32>
    %cst_38 = arith.constant 1.000000e+00 : f32
    %54 = vector.broadcast %cst_38 : f32 to vector<32x1xf32>
    %55 = arith.addf %54, %53 : vector<32x1xf32>
    %56 = arith.divf %54, %55 : vector<32x1xf32>
    %c0_39 = arith.constant 0 : index
    %c0_40 = arith.constant 0 : index
    %c0_41 = arith.constant 0 : index
    %57 = vector.load %arg4[%c0_39, %c0_40, %c0_41] : memref<1x32x256xf32, #tpu.memory_space<vmem>>, vector<1x32x256xf32>
    %58 = vector.shape_cast %57 : vector<1x32x256xf32> to vector<32x256xf32>
    %59 = vector.broadcast %56 : vector<32x1xf32> to vector<32x256xf32>
    %60 = arith.mulf %58, %59 : vector<32x256xf32>
    %c0_42 = arith.constant 0 : index
    %c0_43 = arith.constant 0 : index
    %c0_44 = arith.constant 0 : index
    %61 = vector.load %arg4[%c0_42, %c0_43, %c0_44] : memref<1x32x256xf32, #tpu.memory_space<vmem>>, vector<1x32x256xf32>
    %62 = vector.shape_cast %61 : vector<1x32x256xf32> to vector<32x256xf32>
    %63 = vector.shape_cast %60 : vector<32x256xf32> to vector<1x32x256xf32>
    tpu.vector_store %arg4[%c0_42, %c0_43, %c0_44], %63 {strides = array<i32>} : memref<1x32x256xf32, #tpu.memory_space<vmem>>, vector<1x32x256xf32>,
    return
  }
  func.func @transform_0(%arg0: i32) -> (i32, i32, i32) {
    %c0_i32 = arith.constant 0 : i32
    %c0_i32_0 = arith.constant 0 : i32
    %c0_i32_1 = arith.constant 0 : i32
    return %arg0, %c0_i32, %c0_i32_0 : i32, i32, i32
  }
  func.func @transform_1(%arg0: i32) -> (i32, i32, i32) {
    %c0_i32 = arith.constant 0 : i32
    %c0_i32_0 = arith.constant 0 : i32
    %c0_i32_1 = arith.constant 0 : i32
    %c0_i32_2 = arith.constant 0 : i32
    return %c0_i32, %c0_i32_0, %c0_i32_1 : i32, i32, i32
  }
  func.func @transform_2(%arg0: i32) -> (i32, i32, i32) {
    %c0_i32 = arith.constant 0 : i32
    %c0_i32_0 = arith.constant 0 : i32
    %c0_i32_1 = arith.constant 0 : i32
    %c0_i32_2 = arith.constant 0 : i32
    return %c0_i32, %c0_i32_0, %c0_i32_1 : i32, i32, i32
  }
  func.func @transform_3(%arg0: i32) -> (i32, i32, i32) {
    %c0_i32 = arith.constant 0 : i32
    %c0_i32_0 = arith.constant 0 : i32
    %c0_i32_1 = arith.constant 0 : i32
    return %arg0, %c0_i32, %c0_i32_0 : i32, i32, i32
  }
}

</mosaic_0001>

<bundles_post_ra>
// kernel: tpu_custom_call.1
= control target key start
LH: loop header
LB: loop body
LE: loop exit
PB: predicated region body
PF: predicated region fallthrough
CT: control target
= control target key end

     0   :  { %8 = vsyncpa [#allocation3], 0  ;;  %s1653_s0 = inlined_call_operand.hbm [shape: f32[2,32,256], index: 0, kind: input, shape index: {}, may-alias: {0,3}]   ;;  %s1654_s1 = inlined_call_operand.vmem [shape: f32[2,2,32], index: 1, kind: input, shape index: {}]   ;;  %s1655_s2 = inlined_call_operand.vmem [shape: f32[2,32,2], index: 2, kind: input, shape index: {}]   ;;  %s1656_s3 = inlined_call_operand.hbm [shape: f32[2,32,256], index: 3, kind: output, shape index: {}, may-alias: {0,3}]  }
   0x1   :  { %10 = vsyncpa [#allocation3 + $0x1], 0 }
   0x2   :  { %11 = vsyncpa [#allocation4], 0 }
   0x3   :  { %13 = vsyncpa [#allocation4 + $0x1], 0  ;;  %s1349_s12 = smov 0   ;;  %s1351_s13 = smov 0  }
   0x4   :  { %s1353_s14 = smov 0   ;;  %s1355_s15 = smov 0  }
   0x5 LB: > { %s1370_s16 = sadd.s32 4294967295, %s1317_s15   ;;  %s976_s17 = sadd.s32 4294967294, %s1317_s15   ;;  %s1317_s15 = sphi %s1355_s15, %s1669_s15   ;;  %s1313_s14 = sphi %s1353_s14, %s1668_s14   ;;  %s1309_s13 = sphi %s1351_s13, %s1667_s13   ;;  %s1305_s12 = sphi %s1349_s12, %s1666_s12  }
   0x6   : > { %s1374_s18 = sadd.s32 1, %s1317_s15   ;;  %s26_s19 = sadd.s32 1, %s1313_s14 }
   0x7   : > { %s23_s20 = ssub.s32 %s1317_s15, %s1374_s18  ;;  %p33_p0 = scmp.ne.s32.totalorder %s1313_s14, %s1309_s13 }
   0x8   : > { %p24_p1 = scmp.eq.s32.totalorder %s23_s20, 0  ;;  %p34_p2 = scmp.eq.s32.totalorder %s1317_s15, 0 }
   0x9   : > { %p39_p3 = scmp.ne.s32.totalorder %s1309_s13, %s1305_s12  ;;  %p40_p4 = scmp.eq.s32.totalorder %s1370_s16, 0 }
   0xa   : > { %s1386_s21 = scalar_select %p24_p1, %s1313_s14, %s26_s19  }
   0xb   : > { %p1388_p5 = por %p34_p2, %p33_p0  ;;  %p1392_p6 = por %p40_p4, %p39_p3 }
   0xc   : > { %p105_p7 = scmp.eq.s32.totalorder %s1370_s16, 1  ;;  %p111_p8 = scmp.eq.s32.totalorder %s976_s17, 1 }
   0xd   : > { %p1145_p10 = scmp.lt.s32.totalorder %s1317_s15, 2  ;;  %s137_s26 = sand.u32 1, %s1313_s14  }
   0xe   : > { %p1399_p11 = por %p105_p7, %p33_p0  ;;  %p1403_p12 = por %p111_p8, %p39_p3 }
   0xf   : > { %s1017_s27 = sshll.u32 %s1317_s15, 10  ;;  %s979_s28 = sshll.u32 %s137_s26, 6 }
  0x10   : > { %s1660_s24 = scalar_select %p1399_p11, 1, 0 }
  0x11   : > { %s1661_s25 = scalar_select %p1403_p12, 1, 0 }
  0x12   : > { %s1412_s4 = scalar_lea.hbm %s1653_s0, %s1017_s27  ;;  %s141_s5 = scalar_lea.vmem [#allocation2], %s979_s28 }
  0x13   : > { %s148_s6 = sshll.u32 %s141_s5, 4  ;;  %p1416_p13 = pnand %p1145_p10, %p1388_p5  ;;  %s1420_s6 = int_to_ptr.vmem [resolvable:$true] %s148_s6 }
  0x14   : > { %s1422_s8 = scalar_lea.sflag [#allocation3], %s137_s26  ;;  %s1221_s9 = scalar_lea.hbm %s1412_s4, 1024 }
  0x15   : > { %p1222_p0 = scmp.ne.s32.totalorder %s1412_s4, %s1221_s9  ;;  %p1223_p1 = pneg %p1416_p13 }
  0x16   : > { %s1226_s17 = scalar_lea.hbm %s1653_s0, 2048  ;;  %p1227_p4 = scmp.lt.u32.totalorder %s1412_s4, %s1653_s0 }
  0x17   : > { %p1224_p2 = pnand %p1223_p1, %p1222_p0  ;;  %p1228_p5 = scmp.lt.u32.totalorder %s1226_s17, %s1221_s9 }
  0x18   : > { %p1230_p8 = scmp.lt.u32.totalorder %s1221_s9, %s1412_s4 }
  0x19   : > { %p1225_p3 = pneg %p1224_p2  ;;  %p1229_p7 = por %p1228_p5, %p1227_p4 }
  0x1b   : > { %p1231_p10 = por %p1230_p8, %p1229_p7 }
  0x1d   : > { %p1232_p9 = pnand %p1231_p10, %p1225_p3 }
  0x1f   : > { %1235 = shalt.err (!%p1232_p9)
}
  0x20   : > { %s1236_s22 = scalar_lea.vmem %s1420_s6, 1024  ;;  %s1319_s26 = smov [#allocation2]  }
  0x21   : > { %p1237_p0 = scmp.ne.s32.totalorder %s1420_s6, %s1236_s22  ;;  %s1241_s27 = sshll.u32 %s1319_s26, 4  ;;  %s1242_s27 = int_to_ptr.vmem [resolvable:$false] %s1241_s27 }
  0x22   : > { %s1243_s28 = scalar_lea.vmem %s1242_s27, 2048  ;;  %p1244_p11 = scmp.lt.s32.totalorder %s1420_s6, %s1242_s27 }
  0x23   : > { %p1239_p2 = pnand %p1237_p0, %p1223_p1  ;;  %p1245_p4 = scmp.lt.s32.totalorder %s1243_s28, %s1236_s22 }
  0x25   : > { %p1240_p12 = pneg %p1239_p2  ;;  %p1246_p5 = por %p1245_p4, %p1244_p11 }
  0x27   : > { %p1247_p7 = pnand %p1246_p5, %p1240_p12 }
  0x29   : > { %1250 = shalt.err (!%p1247_p7)
}
  0x2a   : > { %s1320_s29 = smov 256   ;;  %s1321_s30 = smov 16  }
  0x2b   : > { %1140 = dma.hbm_to_vmem [thread:$0]  (!%p1416_p13), %s1412_s4, 1024, %s1420_s6, %s1422_s8, %s1320_s29, %s1320_s29, %s1321_s30  }
  0x2c   : > { %p982_p9 = scmp.ge.s32.totalorder %s1317_s15, 1  ;;  %p156_p1 = scmp.lt.s32.totalorder %s1317_s15, 3 }
  0x2e   : > { %p157_p3 = pnand %p982_p9, %p156_p1 }
  0x2f   : > { %s1453_s5 = sand.u32 (!%p157_p3), 1, %s1309_s13  }
  0x30   : > { %160 = sbr.rel (%p157_p3) target bundleno = 1580 (0x62c), region = 32  ;;  %s983_s9 = sshll.u32 (!%p157_p3), %s1453_s5, 6 }
  0x31   : > { %s163_s10 = scalar_lea.sflag (!%p157_p3), [#allocation3], %s1453_s5  ;;  %s166_s11 = scalar_lea.vmem (!%p157_p3), [#allocation2], %s983_s9 }
  0x37   : > { %1296 = dma.done.wait (%p1392_p6), %s163_s10, 1024  }
  0x38   : > { %1298 = vsyncadd (%p1392_p6), %s163_s10, 4294966272  ;;  %v1463_v0 = vld [vmem:[%s166_s11] sm:$0xff]  ;;  %v1465_v1 = vld [vmem:[%s166_s11 + $0x8] sm:$0xff]  ;;  %v1322_v16 = vmov 0.0|0.0   ;;  %vm1323_vm0 = vmmov 0   ;;  %v1324_v17 = vmov 0.0  }
  0x39   : > { %v1467_v2 = vld [vmem:[%s166_s11 + $0x10] sm:$0xff]  ;;  %v214_v3 = vmax.f32 %v1463_v0, %v1465_v1  ;;  %v197_v4 = vadd.f32 %v1465_v1, %v1463_v0  ;;  %v1473_v5 = vld [vmem:[%s166_s11 + $0x18] sm:$0xff]  ;;  %v1483_v10 = vld [vmem:[%s166_s11 + $0x20] sm:$0xff]  ;;  %1115 = vmatprep.subr.bf16.mxu1 %v1322_v16  ;;  %1109 = vmatprep.subr.bf16.mxu0 %v1322_v16  ;;  %vm231_vm1 = vcmask 261120   ;;  %vm378_vm2 = vcmask 15360   ;;  %s1018_s8 = sshll.u32 %s1370_s16, 10 }
  0x3a   : > { %v217_v6 = vmax.f32 %v1467_v2, %v1473_v5  ;;  %v200_v7 = vadd.f32 %v1473_v5, %v1467_v2  ;;  %v1479_v8 = vld [vmem:[%s166_s11 + $0x30] sm:$0xff]  ;;  %v1481_v9 = vld [vmem:[%s166_s11 + $0x38] sm:$0xff]  ;;  %v1485_v11 = vld [vmem:[%s166_s11 + $0x28] sm:$0xff]  ;;  %1057 = vmatprep.mubr.msk.f32.mxu0 %vm1323_vm0, %v1324_v17  ;;  %1068 = vmatprep.mubr.msk.f32.mxu1 %vm1323_vm0, %v1324_v17  ;;  %vm391_vm3 = vcmask 1041408   ;;  %v1325_v46 = vmov 0   ;;  %s188_s17 = scalar_lea.vmem [#allocation5], %s983_s9  ;;  %s1603_s26 = scalar_lea.hbm %s1656_s3, %s1018_s8 }
  0x3b   : > { %215 = vmax.xlane.f32.xlu1 %v214_v3  ;;  %198 = vadd.xlane.f32.xlu0 %v197_v4  ;;  %v206_v12 = vadd.f32 %v1481_v9, %v1479_v8  ;;  %v203_v13 = vadd.f32 %v1485_v11, %v1483_v10  ;;  %v223_v14 = vmax.f32 %v1479_v8, %v1481_v9  ;;  %v226_v34 = vld [vmem:[%s1654_s1] sm:$0x3]  ;;  %v228_v43 = vld [vmem:[%s1655_s2 + $0x8] sm:$0xff]  ;;  %v229_v44 = vld [vmem:[%s1655_s2 + $0x10] sm:$0xff]  ;;  %s903_s19 = sshll.u32 %s188_s17, 4  ;;  %s890_s16 = scalar_lea.sflag [#allocation4], %s1453_s5  ;;  %s1605_s19 = int_to_ptr.vmem [resolvable:$true] %s903_s19 }
  0x3c   : > { %v220_v15 = vmax.f32 %v1483_v10, %v1485_v11  ;;  %v227_v35 = vld [vmem:[%s1655_s2] sm:$0xff]  ;;  %v230_v45 = vld [vmem:[%s1655_s2 + $0x18] sm:$0xff]  ;;  %1188 = vset.pattern.permute.xlu1 %v1325_v46  ;;  %1187 = vset.pattern.permute.xlu0 %v1325_v46  ;;  %s1251_s9 = scalar_lea.vmem %s1605_s19, 1024  ;;  %p1663_p11 = scmp.ne.s32.totalorder %s1660_s24, 0 }
  0x3d   : > { %p1252_p6 = scmp.ne.s32.totalorder %s1605_s19, %s1251_s9  ;;  %s1326_s27 = smov [#allocation5]  }
  0x3e   : > { %s1255_s28 = sshll.u32 %s1326_s27, 4  ;;  %s1256_s28 = int_to_ptr.vmem [resolvable:$false] %s1255_s28 }
  0x3f   : > { %218 = vmax.xlane.f32.xlu1 %v217_v6  ;;  %201 = vadd.xlane.f32.xlu0 %v200_v7  ;;  %p1253_p12 = pnand %p1252_p6, %p1663_p11  ;;  %s1257_s29 = scalar_lea.vmem %s1256_s28, 2048 }
  0x40   : > { %p1258_p8 = scmp.lt.s32.totalorder %s1605_s19, %s1256_s28  ;;  %p1259_p10 = scmp.lt.s32.totalorder %s1257_s29, %s1251_s9 }
  0x41   : > { %p1254_p13 = pneg %p1253_p12 }
  0x42   : > { %p1260_p0 = por %p1259_p10, %p1258_p8 }
  0x43   : > { %207 = vadd.xlane.f32.xlu1 %v206_v12  ;;  %204 = vadd.xlane.f32.xlu0 %v203_v13 }
  0x44   : > { %p1261_p2 = pnand %p1260_p0, %p1254_p13 }
  0x47   : > { %224 = vmax.xlane.f32.xlu1 %v223_v14  ;;  %221 = vmax.xlane.f32.xlu0 %v220_v15 }
  0xc8   : > { %v216_v18 = vpop.xlane.xlu1 %215  ;;  %v199_v19 = vpop.xlane.xlu0 %198 }
  0xc9   : > { %v210_v22 = vmul.f32 0.00390625, %v199_v19 }
  0xcc   : > { %v219_v20 = vpop.xlane.xlu1 %218  ;;  %v202_v21 = vpop.xlane.xlu0 %201 }
  0xcd   : > { %v1116_v23 = vpack.c.bf16 %v219_v20, %v216_v18  ;;  %v211_v24 = vmul.f32 0.00390625, %v202_v21 }
  0xcf   : > { %1117 = vmatpush3.bf16.msra.mxu1 %v1116_v23  ;;  %v1110_v25 = vpack.c.bf16 %v211_v24, %v210_v22 }
  0xd0   : > { %v208_v26 = vpop.xlane.xlu1 %207  ;;  %v205_v27 = vpop.xlane.xlu0 %204  ;;  %1118 = vmatprep.subr.bf16.mxu1 %v1322_v16 }
  0xd1   : > { %v213_v28 = vmul.f32 0.00390625, %v208_v26  ;;  %v212_v29 = vmul.f32 0.00390625, %v205_v27  ;;  %1111 = vmatpush3.bf16.msra.mxu0 %v1110_v25 }
  0xd2   : > { %1112 = vmatprep.subr.bf16.mxu0 %v1322_v16 }
  0xd3   : > { %v1113_v30 = vpack.c.bf16 %v213_v28, %v212_v29 }
  0xd4   : > { %v225_v31 = vpop.xlane.xlu1 %224  ;;  %v222_v32 = vpop.xlane.xlu0 %221 }
  0xd5   : > { %v1119_v33 = vpack.c.bf16 %v225_v31, %v222_v32  ;;  %1114 = vmatpush3.bf16.msra.mxu0 %v1113_v30 }
  0xd7   : > { %1120 = vmatpush3.bf16.msra.mxu1 %v1119_v33 }
  0xd8   : > { %1058 = vmatmul.mubr.msk.f32.vlgmr.msra.gmra.mrb[0].mxu0 %vm231_vm1, %v226_v34  ;;  %1121 = vmatprep.subr.bf16.mxu1 %v1322_v16 }
  0xd9   : > { %1073 = vmatprep.mubr.msk.f32.mxu0 %vm378_vm2, %v227_v35 }
  0xda   : > { %1069 = vmatmul.mubr.msk.f32.vlgmr.msra.gmra.mrb[0].mxu1 %vm231_vm1, %v226_v34 }
  0xdb   : > { %1087 = vmatprep.mubr.msk.f32.mxu1 %vm1323_vm0, %v1324_v17 }
 0x1ab   : > { %v301_v36 = vpop.f32.mrb[0].mxu0 }
 0x1ac   : > { %v305_v37 = vmax.f32 %v301_v36, 0.0  ;;  %v1059_v38 = vpop.f32.mrb[1].mxu0 }
 0x1ad   : > { %v372_v39 = vpop.f32.mrb[0].mxu1 }
 0x1ae   : > { %v376_v40 = vmax.f32 %v372_v39, 0.0  ;;  %v1070_v41 = vpop.f32.mrb[1].mxu1 }
 0x1b0   : > { %v377_v42 = vadd.f32 %v376_v40, %v305_v37  ;;  %v996_v40 = vld [vmem:[%s1654_s1 + $0x2] sm:$0x3] }
 0x1b2   : > { %1071 = vmatprep.subr.msk.mxu0 %vm391_vm3, %v377_v42 }
 0x1b3   : > { %1072 = vmatpush3.msk.msra.mxu0 %vm391_vm3, %v377_v42 }
 0x1b4   : > { %1074 = vmatmul.mubr.msk.f32.vlgmr.msra.gmra.mrb[2].mxu0 %vm378_vm2, %v228_v43  ;;  %1127 = vmatprep.subr.bf16.mxu0 %v1322_v16 }
 0x1b5   : > { %1076 = vmatprep.mubr.msk.f32.mxu0 %vm378_vm2, %v229_v44 }
 0x1b8   : > { %1077 = vmatmul.mubr.msk.f32.gmra.mrb[4].mxu0 %vm378_vm2, %v230_v45 }
 0x1b9   : > { %1098 = vmatprep.mubr.msk.f32.mxu0 %vm1323_vm0, %v1324_v17 }
 0x287   : > { %v1075_v47 = vpop.f32.mrb[2].mxu0 }
 0x288   : > { %v993_v48 = vmul.f32 -1.442695, %v1075_v47  ;;  %v461_v49 = vpop.f32.mrb[3].mxu0 }
 0x289   : > { %v992_v50 = vmul.f32 -1.442695, %v461_v49  ;;  %v999_v49 = vld [vmem:[%s1655_s2 + $0x30] sm:$0xff] }
 0x28a   : > { %1189 = vpow2.f32 %v993_v48  ;;  %v998_v48 = vld [vmem:[%s1655_s2 + $0x28] sm:$0xff] }
 0x28b   : > { %1191 = vpow2.f32 %v992_v50  ;;  %v1078_v51 = vpop.f32.mrb[4].mxu0  ;;  %v1000_v50 = vld [vmem:[%s1655_s2 + $0x38] sm:$0xff] }
 0x28c   : > { %v995_v52 = vmul.f32 -1.442695, %v1078_v51  ;;  %v471_v53 = vpop.f32.mrb[5].mxu0 }
 0x28d   : > { %v994_v54 = vmul.f32 -1.442695, %v471_v53 }
 0x28e   : > { %1193 = vpow2.f32 %v995_v52 }
 0x28f   : > { %1195 = vpow2.f32 %v994_v54 }
 0x294   : > { %v1190_v55 = vpop.eup %1189 }
 0x295   : > { %v1192_v56 = vpop.eup %1191  ;;  %v493_v57 = vadd.f32 1.0, %v1190_v55 }
 0x296   : > { %v492_v58 = vadd.f32 1.0, %v1192_v56 }
 0x297   : > { %1197 = vrcp.f32 %v493_v57 }
 0x298   : > { %v1194_v59 = vpop.eup %1193  ;;  %1199 = vrcp.f32 %v492_v58 }
 0x299   : > { %v1196_v60 = vpop.eup %1195  ;;  %v495_v62 = vadd.f32 1.0, %v1194_v59 }
 0x29a   : > { %v494_v61 = vadd.f32 1.0, %v1196_v60 }
 0x29c   : > { %1201 = vrcp.f32 %v494_v61 }
 0x29d   : > { %1203 = vrcp.f32 %v495_v62 }
 0x2a1   : > { %v1198_v63 = vpop.eup %1197 }
 0x2a2   : > { %v1200_v3 = vpop.eup %1199  ;;  %511 = vperm.xlu1 %1188, %v1198_v63  }
 0x2a3   : > { %506 = vperm.xlu0 %1187, %v1200_v3  }
 0x2a6   : > { %v1202_v4 = vpop.eup %1201 }
 0x2a7   : > { %516 = vperm.xlu1 %1188, %v1202_v4   ;;  %v1204_v6 = vpop.eup %1203 }
 0x2ab   : > { %521 = vperm.xlu1 %1188, %v1204_v6  }
 0x321   : > { %v512_v7 = vpop.permute.xlu1 %511 }
 0x322   : > { %v1529_v12 = vmul.f32 %v512_v7, %v1467_v2  ;;  %v1532_v13 = vmul.f32 %v512_v7, %v1473_v5  ;;  %v507_v14 = vpop.permute.xlu0 %506 }
 0x323   : > { %v1535_v15 = vmul.f32 %v507_v14, %v1463_v0  ;;  %v1538_v17 = vmul.f32 %v507_v14, %v1465_v1 }
 0x324   : > { %v551_v18 = vadd.f32 %v1532_v13, %v1529_v12  ;;  %v567_v19 = vmax.f32 %v1529_v12, %v1532_v13 }
 0x325   : > { %v548_v0 = vadd.f32 %v1538_v17, %v1535_v15 }
 0x326   : > { %v517_v20 = vpop.permute.xlu1 %516  ;;  %552 = vadd.xlane.f32.xlu0 %v551_v18  ;;  %568 = vmax.xlane.f32.xlu1 %v567_v19 }
 0x327   : > { %v1545_v2 = vmul.f32 %v517_v20, %v1483_v10  ;;  %v1548_v5 = vmul.f32 %v517_v20, %v1485_v11  ;;  %v564_v10 = vmax.f32 %v1535_v15, %v1538_v17 }
 0x329   : > { %v570_v1 = vmax.f32 %v1545_v2, %v1548_v5  ;;  %v554_v24 = vadd.f32 %v1548_v5, %v1545_v2 }
 0x32a   : > { %v522_v21 = vpop.permute.xlu1 %521  ;;  %549 = vadd.xlane.f32.xlu1 %v548_v0 }
 0x32b   : > { %571 = vmax.xlane.f32.xlu0 %v570_v1  ;;  %v1555_v22 = vmul.f32 %v522_v21, %v1479_v8  ;;  %v1558_v23 = vmul.f32 %v522_v21, %v1481_v9 }
 0x32d   : > { %v557_v11 = vadd.f32 %v1558_v23, %v1555_v22  ;;  %v573_v25 = vmax.f32 %v1555_v22, %v1558_v23 }
 0x32e   : > { %565 = vmax.xlane.f32.xlu1 %v564_v10 }
 0x332   : > { %558 = vadd.xlane.f32.xlu1 %v557_v11 }
 0x336   : > { %555 = vadd.xlane.f32.xlu1 %v554_v24 }
 0x33a   : > { %574 = vmax.xlane.f32.xlu1 %v573_v25 }
 0x3b3   : > { %v569_v8 = vpop.xlane.xlu1 %568  ;;  %v553_v26 = vpop.xlane.xlu0 %552 }
 0x3b4   : > { %v561_v27 = vmul.f32 0.00390625, %v553_v26 }
 0x3b7   : > { %v550_v9 = vpop.xlane.xlu1 %549 }
 0x3b8   : > { %v560_v28 = vmul.f32 0.00390625, %v550_v9  ;;  %v572_v37 = vpop.xlane.xlu0 %571 }
 0x3ba   : > { %v1122_v29 = vpack.c.bf16 %v561_v27, %v560_v28 }
 0x3bb   : > { %v566_v30 = vpop.xlane.xlu1 %565 }
 0x3bc   : > { %v1128_v31 = vpack.c.bf16 %v569_v8, %v566_v30  ;;  %1123 = vmatpush3.bf16.msra.mxu1 %v1122_v29 }
 0x3bd   : > { %1124 = vmatprep.subr.bf16.mxu1 %v1322_v16 }
 0x3be   : > { %1129 = vmatpush3.bf16.msra.mxu0 %v1128_v31 }
 0x3bf   : > { %v559_v32 = vpop.xlane.xlu1 %558  ;;  %1130 = vmatprep.subr.bf16.mxu0 %v1322_v16  ;;  %v997_v16 = vld [vmem:[%s1655_s2 + $0x20] sm:$0xff] }
 0x3c0   : > { %v563_v34 = vmul.f32 0.00390625, %v559_v32 }
 0x3c3   : > { %v556_v33 = vpop.xlane.xlu1 %555 }
 0x3c4   : > { %v562_v35 = vmul.f32 0.00390625, %v556_v33 }
 0x3c6   : > { %v1125_v36 = vpack.c.bf16 %v563_v34, %v562_v35 }
 0x3c7   : > { %v575_v38 = vpop.xlane.xlu1 %574 }
 0x3c8   : > { %v1131_v39 = vpack.c.bf16 %v575_v38, %v572_v37  ;;  %1126 = vmatpush3.bf16.msra.mxu1 %v1125_v36 }
 0x3ca   : > { %1132 = vmatpush3.bf16.msra.mxu0 %v1131_v39 }
 0x3cb   : > { %1088 = vmatmul.mubr.msk.f32.vlgmr.msra.gmra.mrb[2].mxu1 %vm231_vm1, %v996_v40 }
 0x3cc   : > { %1103 = vmatprep.mubr.msk.f32.mxu1 %vm378_vm2, %v997_v16 }
 0x3cd   : > { %1099 = vmatmul.mubr.msk.f32.vlgmr.msra.gmra.mrb[6].mxu0 %vm231_vm1, %v996_v40 }
 0x49e   : > { %v652_v41 = vpop.f32.mrb[2].mxu1 }
 0x49f   : > { %v656_v42 = vmax.f32 %v652_v41, 0.0  ;;  %v1089_v43 = vpop.f32.mrb[3].mxu1 }
 0x4a0   : > { %v723_v44 = vpop.f32.mrb[6].mxu0 }
 0x4a1   : > { %v727_v45 = vmax.f32 %v723_v44, 0.0  ;;  %v1100_v46 = vpop.f32.mrb[7].mxu0 }
 0x4a3   : > { %v728_v47 = vadd.f32 %v727_v45, %v656_v42 }
 0x4a5   : > { %1101 = vmatprep.subr.msk.mxu1 %vm391_vm3, %v728_v47 }
 0x4a6   : > { %1102 = vmatpush3.msk.msra.mxu1 %vm391_vm3, %v728_v47 }
 0x4a7   : > { %1104 = vmatmul.mubr.msk.f32.vlgmr.msra.gmra.mrb[4].mxu1 %vm378_vm2, %v998_v48 }
 0x4a8   : > { %1106 = vmatprep.mubr.msk.f32.mxu1 %vm378_vm2, %v999_v49 }
 0x4ab   : > { %1107 = vmatmul.mubr.msk.f32.gmra.mrb[6].mxu1 %vm378_vm2, %v1000_v50 }
 0x57a   : > { %v1105_v51 = vpop.f32.mrb[4].mxu1 }
 0x57b   : > { %v1009_v52 = vmul.f32 -1.442695, %v1105_v51  ;;  %v810_v53 = vpop.f32.mrb[5].mxu1 }
 0x57c   : > { %v1008_v54 = vmul.f32 -1.442695, %v810_v53 }
 0x57d   : > { %1205 = vpow2.f32 %v1009_v52 }
 0x57e   : > { %1207 = vpow2.f32 %v1008_v54  ;;  %v1108_v55 = vpop.f32.mrb[6].mxu1 }
 0x57f   : > { %v1011_v56 = vmul.f32 -1.442695, %v1108_v55  ;;  %v820_v57 = vpop.f32.mrb[7].mxu1 }
 0x580   : > { %v1010_v58 = vmul.f32 -1.442695, %v820_v57 }
 0x581   : > { %1209 = vpow2.f32 %v1011_v56 }
 0x582   : > { %1211 = vpow2.f32 %v1010_v58 }
 0x587   : > { %v1206_v59 = vpop.eup %1205 }
 0x588   : > { %v1208_v60 = vpop.eup %1207  ;;  %v842_v61 = vadd.f32 1.0, %v1206_v59 }
 0x589   : > { %v841_v62 = vadd.f32 1.0, %v1208_v60 }
 0x58a   : > { %1213 = vrcp.f32 %v842_v61 }
 0x58b   : > { %v1210_v63 = vpop.eup %1209  ;;  %1215 = vrcp.f32 %v841_v62 }
 0x58c   : > { %v1212_v3 = vpop.eup %1211  ;;  %v844_v4 = vadd.f32 1.0, %v1210_v63 }
 0x58d   : > { %v843_v6 = vadd.f32 1.0, %v1212_v3 }
 0x58e   : > { %1217 = vrcp.f32 %v844_v4 }
 0x58f   : > { %1219 = vrcp.f32 %v843_v6 }
 0x594   : > { %v1214_v7 = vpop.eup %1213 }
 0x595   : > { %v1216_v14 = vpop.eup %1215  ;;  %860 = vperm.xlu1 %1188, %v1214_v7  }
 0x596   : > { %855 = vperm.xlu0 %1187, %v1216_v14  }
 0x598   : > { %v1218_v18 = vpop.eup %1217 }
 0x599   : > { %v1220_v19 = vpop.eup %1219 }
 0x59a   : > { %870 = vperm.xlu0 %1187, %v1218_v18   ;;  %865 = vperm.xlu1 %1188, %v1220_v19  }
 0x614   : > { %v861_v20 = vpop.permute.xlu1 %860 }
 0x615   : > { %v875_v0 = vmul.f32 %v861_v20, %v1529_v12  ;;  %v876_v1 = vmul.f32 %v861_v20, %v1532_v13  ;;  %v856_v21 = vpop.permute.xlu0 %855 }
 0x616   : > { %v873_v10 = vmul.f32 %v856_v21, %v1535_v15  ;;  %v874_v11 = vmul.f32 %v856_v21, %v1538_v17 }
 0x617   : > { %883 = vst [vmem:[%s188_s17 + $0x10] sm:$0xff] %v875_v0  ;;  %884 = vst [vmem:[%s188_s17 + $0x18] sm:$0xff] %v876_v1 }
 0x618   : > { %881 = vst [vmem:[%s188_s17] sm:$0xff] %v873_v10  ;;  %882 = vst [vmem:[%s188_s17 + $0x8] sm:$0xff] %v874_v11 }
 0x619   : > { %v871_v24 = vpop.permute.xlu0 %870  ;;  %v866_v25 = vpop.permute.xlu1 %865 }
 0x61a   : > { %v879_v12 = vmul.f32 %v871_v24, %v1555_v22  ;;  %v880_v13 = vmul.f32 %v871_v24, %v1558_v23  ;;  %v877_v15 = vmul.f32 %v866_v25, %v1545_v2  ;;  %v878_v17 = vmul.f32 %v866_v25, %v1548_v5 }
 0x61c   : > { %887 = vst [vmem:[%s188_s17 + $0x30] sm:$0xff] %v879_v12  ;;  %888 = vst [vmem:[%s188_s17 + $0x38] sm:$0xff] %v880_v13 }
 0x61d   : > { %885 = vst [vmem:[%s188_s17 + $0x20] sm:$0xff] %v877_v15  ;;  %886 = vst [vmem:[%s188_s17 + $0x28] sm:$0xff] %v878_v17 }
 0x61e   : > { %1264 = shalt.err (!%p1261_p2)
}
 0x61f   : > { %s1265_s30 = scalar_lea.hbm %s1603_s26, 1024  ;;  %s1269_s23 = scalar_lea.hbm %s1656_s3, 2048 }
 0x620   : > { %p1266_p4 = scmp.ne.s32.totalorder %s1603_s26, %s1265_s30  ;;  %p1270_p9 = scmp.lt.u32.totalorder %s1603_s26, %s1656_s3 }
 0x621   : > { %p1271_p1 = scmp.lt.u32.totalorder %s1269_s23, %s1265_s30  ;;  %p1273_p6 = scmp.lt.u32.totalorder %s1265_s30, %s1603_s26 }
 0x622   : > { %p1267_p5 = pnand %p1266_p4, %p1663_p11 }
 0x623   : > { %p1272_p3 = por %p1271_p1, %p1270_p9 }
 0x624   : > { %p1268_p7 = pneg %p1267_p5 }
 0x625   : > { %p1274_p12 = por %p1273_p6, %p1272_p3 }
 0x627   : > { %p1275_p13 = pnand %p1274_p12, %p1268_p7 }
 0x629   : > { %1278 = shalt.err (!%p1275_p13)
}
 0x62a   : > { %s1327_s7 = smov 256   ;;  %s1328_s8 = smov 16  }
 0x62b   : > { %1135 = dma.vmem_to_hbm [thread:$0]  (%p1663_p11), %s1605_s19, 1024, %s1603_s26, %s890_s16, %s1327_s7, %s1327_s7, %s1328_s8  }
 0x62c PF: > { %s918_s17 = sand.u32 1, %s1305_s12   ;;  %p1664_p8 = scmp.ne.s32.totalorder %s1661_s25, 0 }
 0x62d   : > { %p1665_p10 = scmp.ge.s32.totalorder %s1317_s15, 2  ;;  %s919_s20 = scalar_lea.sflag [#allocation4], %s918_s17 }
 0x62f   : > { %p1142_p0 = pnand %p1665_p10, %p1664_p8 }
 0x631   : > { %1300 = dma.done.wait (!%p1142_p0), %s919_s20, 1024  }
 0x632   : > { %1302 = vsyncadd (!%p1142_p0), %s919_s20, 4294966272  ;;  %p16_p2 = scmp.ge.s32.totalorder %s1374_s18, 4   ;;  %s1666_s12 = smov %s1309_s13 }
 0x633   : > { %s1667_s13 = smov %s1313_s14  ;;  %s1668_s14 = smov %s1386_s21 }
 0x634   : > { %s1669_s15 = smov %s1374_s18  ;;  %18 = sbr.rel (!%p16_p2) target bundleno = 5 (0x5), region = 79 }
 0x63b   :  { %924 = vsyncpa [#allocation3], 1 }
 0x63c   :  { %926 = vsyncpa [#allocation3 + $0x1], 1 }
 0x63d   :  { %927 = vsyncpa [#allocation4], 1 }
 0x63e   :  { %929 = vsyncpa [#allocation4 + $0x1], 1 }

</bundles_post_ra>
